<compile_context>
chip_gen: v5e
topology: v5e:2x2
jax: 0.10.0
libtpu: 0.0.40
codegen_flags: <defaults>
</compile_context>

<pallas_src>
import functools
import math

import jax
import jax.numpy as jnp
from jax.experimental import pallas as pl
from jax.experimental.pallas import tpu as pltpu


# ----------------------------- int32 hash helpers -----------------------------


def _i32(v):
    """Python unsigned constant -> int32 constant with two's-complement wraparound."""
    v &= 0xFFFFFFFF
    return jnp.int32(v - (1 << 32) if v >= (1 << 31) else v)


_C_ROW = 0x9E3779B1
_C_COL = 0x85EBCA77
_C_SEED = 0xC2B2AE3D
_M1 = 0x7FEB352D
_M2 = 0x846CA68B


# ----------------------------- Pallas kernel ----------------------------------


def _pos_enc_kernel(seed_ref, x_ref, pe_ref, o_ref, *, p_drop, deterministic, block_rows):
    """o = dropout(x + pe) for one lane-dense (bs, B*E) tile of the sequence axis.

    seed_ref : SMEM (1,) int32 (scalar prefetch)
    x_ref    : VMEM (bs, B*E)
    pe_ref   : VMEM (bs, B*E)  (PE pre-broadcast across the batch in the wrapper, f32)
    o_ref    : VMEM (bs, B*E)
    """
    y = x_ref[...].astype(jnp.float32) + pe_ref[...].astype(jnp.float32)

    if (not deterministic) and (p_drop > 0.0):
        threshold = jnp.int32(min(int(p_drop * (1 << 24)), (1 << 24) - 1))
        inv_keep = jnp.float32(1.0 / (1.0 - p_drop))

        # Stateless per-element hash: deterministic in (seed, absolute row, lane), so the
        # result is independent of tile size and of megacore sharding of the grid.
        rows = (jax.lax.broadcasted_iota(jnp.int32, y.shape, 0)
                + pl.program_id(0) * block_rows)
        cols = jax.lax.broadcasted_iota(jnp.int32, y.shape, 1)
        h = (rows * _i32(_C_ROW)) ^ (cols * _i32(_C_COL)) ^ (seed_ref[0] * _i32(_C_SEED))
        h = h ^ jax.lax.shift_right_logical(h, 16)
        h = h * _i32(_M1)
        h = h ^ jax.lax.shift_right_logical(h, 15)
        h = h * _i32(_M2)
        h = h ^ jax.lax.shift_right_logical(h, 16)
        r = jax.lax.shift_right_logical(h, 8)            # 24 uniform bits, non-negative int32
        keep = r >= threshold                            # P(keep) = 1 - p_drop
        y = jnp.where(keep, y * inv_keep, jnp.float32(0.0))

    o_ref[...] = y.astype(o_ref.dtype)


# ------------------------------- wrapper ---------------------------------------


def _round_up(x, m):
    return ((x + m - 1) // m) * m


def _choose_seq_block(seq_len, row_elems, x_itemsize, vmem_budget_bytes=16 * 1024 * 1024):
    """Largest sequence tile keeping double-buffered x/out (x dtype) + pe (f32) in budget."""
    bytes_per_row = 2 * (2 * x_itemsize + 4) * row_elems   # (x + out + pe_f32) x double-buffer
    bs = vmem_budget_bytes // max(bytes_per_row, 1)
    bs = max(8, (int(bs) // 8) * 8)                        # keep the sublane dim 8-aligned
    if seq_len >= 16:                                      # keep >=2 grid steps for megacore
        bs = min(bs, _round_up(-(-seq_len // 2), 8))
    bs = min(bs, _round_up(seq_len, 8))
    return max(bs, 8)


@functools.partial(jax.jit, static_argnames=("p_drop", "deterministic"))
def positional_encoding_forward(token_embedding, pos_embedding, seed,
                                *, p_drop, deterministic=False):
    """dropout(token_embedding + pos_embedding[:S]) via one Pallas call.

    token_embedding: (S, B, E); pos_embedding: (maxlen, 1, E); seed: int seed for dropout.
    """
    if not 0.0 <= p_drop < 1.0:
        raise ValueError("p_drop must be in [0, 1)")
    s, b, e = token_embedding.shape
    be = b * e

    # Lane-dense view: collapse (B, E) into the last axis (layout plumbing, done by XLA).
    x2 = token_embedding.reshape(s, be)
    pe = pos_embedding[:s].reshape(s, e).astype(jnp.float32)
    pe2 = jnp.tile(pe, (1, b))                              # (S, B*E), broadcast across batch

    bs = _choose_seq_block(s, be, token_embedding.dtype.itemsize)
    num_blocks = pl.cdiv(s, bs)                             # ragged last block: no pad, no slice

    seed_arr = jnp.asarray(seed, dtype=jnp.int32).reshape((1,))
    kernel = functools.partial(_pos_enc_kernel, p_drop=float(p_drop),
                               deterministic=bool(deterministic), block_rows=bs)

    out2 = pl.pallas_call(
        kernel,
        out_shape=jax.ShapeDtypeStruct((s, be), token_embedding.dtype),
        grid_spec=pltpu.PrefetchScalarGridSpec(
            num_scalar_prefetch=1,
            grid=(num_blocks,),
            in_specs=[
                pl.BlockSpec((bs, be), lambda i, seed_smem: (i, 0)),
                pl.BlockSpec((bs, be), lambda i, seed_smem: (i, 0)),
            ],
            out_specs=pl.BlockSpec((bs, be), lambda i, seed_smem: (i, 0)),
        ),
        compiler_params=pltpu.CompilerParams(
            dimension_semantics=("parallel",),
            vmem_limit_bytes=32 * 1024 * 1024,
        ),
    )(seed_arr, x2, pe2)
    return out2.reshape(s, b, e)


# -------------------- buffer construction + pure-JAX reference ------------------


def make_pos_embedding(maxlen, emb_size):
    """Sinusoidal positional-embedding buffer, identical to the PyTorch module."""
    den = jnp.exp(-jnp.arange(0, emb_size, 2, dtype=jnp.float32)
                  * (math.log(10000.0) / emb_size))
    pos = jnp.arange(0, maxlen, dtype=jnp.float32)[:, None]
    pe = jnp.zeros((maxlen, emb_size), dtype=jnp.float32)
    pe = pe.at[:, 0::2].set(jnp.sin(pos * den))
    pe = pe.at[:, 1::2].set(jnp.cos(pos * den))
    return pe[:, None, :]                                    # (maxlen, 1, emb_size)


def positional_encoding_reference(token_embedding, pos_embedding):
    """Eval-mode reference: token_embedding + pos_embedding[:S] (dropout disabled)."""
    return token_embedding + pos_embedding[:token_embedding.shape[0], :]


# ---------------------------------- main ----------------------------------------


if __name__ == "__main__":
    SEQ, BATCH, EMB, MAXLEN, P_DROP = 8, 2, 32, 64, 0.1

    key = jax.random.PRNGKey(0)
    x = jax.random.normal(key, (SEQ, BATCH, EMB), dtype=jnp.float32)
    pos_emb = make_pos_embedding(MAXLEN, EMB)

    # ---- eval mode (dropout off): must match the reference
    out_eval = jax.block_until_ready(
        positional_encoding_forward(x, pos_emb, 0, p_drop=P_DROP, deterministic=True))
    ref = positional_encoding_reference(x, pos_emb)
    assert out_eval.shape == (SEQ, BATCH, EMB), out_eval.shape
    assert jnp.allclose(out_eval, ref, atol=1e-5, rtol=1e-5), float(
        jnp.max(jnp.abs(out_eval - ref)))

    # ---- train mode: every element is either 0 (dropped) or (x+pe)/(1-p);
    #      same seed => identical output; dropped fraction is plausible for p=0.1.
    out_a = jax.block_until_ready(
        positional_encoding_forward(x, pos_emb, 123, p_drop=P_DROP, deterministic=False))
    out_b = jax.block_until_ready(
        positional_encoding_forward(x, pos_emb, 123, p_drop=P_DROP, deterministic=False))
    scaled = ref / (1.0 - P_DROP)
    valid = jnp.isclose(out_a, 0.0, atol=1e-6) | jnp.isclose(out_a, scaled,
                                                             atol=1e-4, rtol=1e-4)
    assert bool(jnp.all(valid))
    assert bool(jnp.all(out_a == out_b))
    dropped = jnp.isclose(out_a, 0.0, atol=1e-6) & ~jnp.isclose(scaled, 0.0, atol=1e-6)
    drop_frac = float(jnp.mean(dropped))
    assert 0.01 <= drop_frac <= 0.35, drop_frac

    print("KERNEL_OK")
</pallas_src>

<mosaic_0001>
module attributes {stable_mosaic.version = 11 : i64} {
  func.func @_pos_enc_kernel(%arg0: i32, %arg1: memref<1xi32, #tpu.memory_space<smem>>, %arg2: memref<8x64xf32, #tpu.memory_space<vmem>>, %arg3: memref<8x64xf32, #tpu.memory_space<vmem>>, %arg4: memref<8x64xf32, #tpu.memory_space<vmem>>) attributes {dimension_semantics = [#tpu.dimension_semantics<parallel>], iteration_bounds = array<i64: 1>, scalar_prefetch = 1 : i64, scratch_operands = 0 : i64, tpu.core_type = #tpu.core_type<tc>, window_params = [{transform_indices = @transform_0, window_bounds = array<i64: 8, 64>}, {transform_indices = @transform_1, window_bounds = array<i64: 8, 64>}, {transform_indices = @transform_2, window_bounds = array<i64: 8, 64>}]} {
    %c0 = arith.constant 0 : index
    %c0_0 = arith.constant 0 : index
    %0 = vector.load %arg2[%c0, %c0_0] : memref<8x64xf32, #tpu.memory_space<vmem>>, vector<8x64xf32>
    %c0_1 = arith.constant 0 : index
    %c0_2 = arith.constant 0 : index
    %1 = vector.load %arg3[%c0_1, %c0_2] : memref<8x64xf32, #tpu.memory_space<vmem>>, vector<8x64xf32>
    %2 = arith.addf %0, %1 : vector<8x64xf32>
    %c0_3 = arith.constant 0 : index
    %c0_4 = arith.constant 0 : index
    %3 = vector.load %arg4[%c0_3, %c0_4] : memref<8x64xf32, #tpu.memory_space<vmem>>, vector<8x64xf32>
    tpu.vector_store %arg4[%c0_3, %c0_4], %2 {strides = array<i32>} : memref<8x64xf32, #tpu.memory_space<vmem>>, vector<8x64xf32>,
    return
  }
  func.func @transform_0(%arg0: i32, %arg1: memref<1xi32, #tpu.memory_space<smem>>) -> (i32, i32) {
    %c0_i32 = arith.constant 0 : i32
    %c0_i32_0 = arith.constant 0 : i32
    return %arg0, %c0_i32 : i32, i32
  }
  func.func @transform_1(%arg0: i32, %arg1: memref<1xi32, #tpu.memory_space<smem>>) -> (i32, i32) {
    %c0_i32 = arith.constant 0 : i32
    %c0_i32_0 = arith.constant 0 : i32
    return %arg0, %c0_i32 : i32, i32
  }
  func.func @transform_2(%arg0: i32, %arg1: memref<1xi32, #tpu.memory_space<smem>>) -> (i32, i32) {
    %c0_i32 = arith.constant 0 : i32
    %c0_i32_0 = arith.constant 0 : i32
    return %arg0, %c0_i32 : i32, i32
  }
}

</mosaic_0001>

<bundles_post_ra>
// kernel: tile.7
= control target key start
LH: loop header
LB: loop body
LE: loop exit
PB: predicated region body
PF: predicated region fallthrough
CT: control target
= control target key end

     0   :  { %vm36_vm0 = vcmask 1047556   ;;  %vm38_vm1 = vcmask 261120   ;;  %vm48_vm2 = vcmask 523520   ;;  %s99_s0 = inlined_call_operand.vmem [shape: f32[8,2,32], index: 0, kind: input, shape index: {}]   ;;  %s100_s1 = inlined_call_operand.vmem [shape: f32[8,64], index: 1, kind: output, shape index: {}]  }
   0x1   :  { %v50_v0 = vld [vmem:[%s99_s0 + $0xe] sm:$0x3]  ;;  %v51_v1 = vld [vmem:[%s99_s0 + $0xc] sm:$0x3]  ;;  %v52_v2 = vld [vmem:[%s99_s0 + $0xa] sm:$0x3] }
   0x2   :  { %7 = vst [vmem:[#allocation0 + $0x38] sm:$0x3] %v50_v0  ;;  %v53_v3 = vld [vmem:[%s99_s0 + $0x8] sm:$0x3]  ;;  %v54_v4 = vld [vmem:[%s99_s0 + $0x6] sm:$0x3] }
   0x3   :  { %11 = vst [vmem:[#allocation0 + $0x30] sm:$0x3] %v51_v1  ;;  %v55_v5 = vld [vmem:[%s99_s0 + $0x4] sm:$0x3]  ;;  %v56_v6 = vld [vmem:[%s99_s0 + $0x2] sm:$0x3] }
   0x4   :  { %15 = vst [vmem:[#allocation0 + $0x28] sm:$0x3] %v52_v2  ;;  %v32_v7 = vld [vmem:[%s99_s0] sm:$0x3]  ;;  %s58_s0 = smov 32  }
   0x5   :  { %19 = vst [vmem:[#allocation0 + $0x20] sm:$0x3] %v53_v3 }
   0x6   :  { %23 = vst [vmem:[#allocation0 + $0x18] sm:$0x3] %v54_v4 }
   0x7   :  { %27 = vst [vmem:[#allocation0 + $0x10] sm:$0x3] %v55_v5 }
   0x8   :  { %31 = vst [vmem:[#allocation0 + $0x8] sm:$0x3] %v56_v6 }
   0x9   :  { %33 = vst [vmem:[#allocation0] sm:$0x3] %v32_v7 }
   0xc   :  { %v35_v8 = vld [vmem:[#allocation0] ss:$8 sm:$0xf0]   ;;  %v43_v9 = vld [vmem:[#allocation0 + $0x1] ss:$8 sm:$0xf0]  }
  0x10   :  { %v34_v10 = vld [vmem:[#allocation0] ss:$8 sm:$0xf]   ;;  %v41_v11 = vld [vmem:[#allocation0 + $0x1] ss:$8 sm:$0xf]  }
  0x11   :  { %v37_v12 = vsel %vm36_vm0, %v35_v8, %v34_v10  ;;  %v45_v13 = vsel %vm36_vm0, %v43_v9, %v41_v11 }
  0x12   :  { %46 = vrot.lane.b32.xlu0 %v45_v13, %s58_s0  ;;  %39 = vst.msk [vmem:[%s100_s1] sm:$0xff] %vm38_vm1, %v37_v12  }
  0x84   :  { %v47_v14 = vpop.permute.xlu0 %46  }
  0x85   :  { %49 = vst.msk [vmem:[%s100_s1] sm:$0xff] %vm48_vm2, %v47_v14  }

// kernel: positional_encoding_forward.1
= control target key start
LH: loop header
LB: loop body
LE: loop exit
PB: predicated region body
PF: predicated region fallthrough
CT: control target
= control target key end

     0   :  { %vm16_vm0 = vcmask 523264   ;;  %s51_s0 = inlined_call_operand.<no memory space> [shape: s32[1], index: 0, kind: input, shape index: {}]   ;;  %s52_s1 = inlined_call_operand.vmem [shape: f32[8,64], index: 1, kind: input, shape index: {}]   ;;  %s53_s2 = inlined_call_operand.vmem [shape: f32[8,64], index: 2, kind: input, shape index: {}]   ;;  %s54_s3 = inlined_call_operand.vmem [shape: f32[8,64], index: 3, kind: output, shape index: {}]  }
   0x1   :  { %v13_v0 = vld [vmem:[%s52_s1] sm:$0xff] }
   0x2   :  { %v14_v1 = vld [vmem:[%s53_s2] sm:$0xff] }
   0x3   :  { %v15_v2 = vadd.f32 %v14_v1, %v13_v0 }
   0x5   :  { %17 = vst.msk [vmem:[%s54_s3] sm:$0xff] %vm16_vm0, %v15_v2 }

</bundles_post_ra>
